<compile_context>
chip_gen: v5e
topology: v5e:2x2
jax: 0.10.0
libtpu: 0.0.40
codegen_flags: <defaults>
</compile_context>

<pallas_src>
import math
from functools import partial

import jax
import jax.numpy as jnp
from jax import lax
from jax.experimental import pallas as pl
from jax.experimental.pallas import tpu as pltpu


def _vmem_limit_bytes():
    # Generation-aware VMEM budget with headroom for compiler scratch:
    # ~51 MiB on v7x (64 MiB physical per TC), 100 MiB on v5e/v6e (128 MiB).
    try:
        cap = int(pltpu.get_tpu_info().vmem_capacity_bytes)
    except Exception:
        cap = 64 * 1024 * 1024
    return min(int(cap * 0.8), 100 * 1024 * 1024)


def _attention_kernel(x_ref, wq_ref, wk_ref, wv_ref, *rest, project_out,
                      compute_dtype):
    # x_ref:  (N, D)      one batch element's tokens (batch dim squeezed)
    # wq/wk/wv_ref: (H, D, d)  head-major projection weights (scale folded in wq)
    # wout_ref: (H, d, D)      per-head output projection   (if project_out)
    # bout_ref: (1, D)         output projection bias (f32) (if project_out)
    # o_ref:  (N, D)
    if project_out:
        wout_ref, bout_ref, o_ref = rest
    else:
        (o_ref,) = rest

    H, _, d = wq_ref.shape
    N, D = x_ref.shape

    # dot_general dimension numbers (batch dim = head, leading on both sides).
    dn_proj = (((2,), (1,)), ((0,), (0,)))   # (H,N,K) x (H,K,M) -> (H,N,M)
    dn_qkT = (((2,), (2,)), ((0,), (0,)))    # (H,N,d) x (H,M,d) -> (H,N,M)

    # Broadcast the token block over heads once (leading-dim broadcast); Q/K/V
    # come out head-major with no in-kernel lane slicing or transposes.
    xh = jnp.broadcast_to(x_ref[...], (H, N, D))

    q = lax.dot_general(xh, wq_ref[...], dn_proj,
                        preferred_element_type=jnp.float32)
    k = lax.dot_general(xh, wk_ref[...], dn_proj,
                        preferred_element_type=jnp.float32)
    v = lax.dot_general(xh, wv_ref[...], dn_proj,
                        preferred_element_type=jnp.float32)
    q = q.astype(compute_dtype)
    k = k.astype(compute_dtype)
    v = v.astype(compute_dtype)

    # Batched QK^T (softmax scale already folded into wq by the wrapper).
    s = lax.dot_general(q, k, dn_qkT,
                        preferred_element_type=jnp.float32)        # (H, N, N)

    # Numerically stable softmax; normalization deferred to the (H, N, d) output.
    s = s - jnp.max(s, axis=-1, keepdims=True)
    p = jnp.exp(s)
    l = jnp.sum(p, axis=-1, keepdims=True)                         # (H, N, 1)

    pv = lax.dot_general(p.astype(compute_dtype), v, dn_proj,
                         preferred_element_type=jnp.float32)       # (H, N, d)
    pv = pv * pl.reciprocal(l, approx=True)                        # EUP, deferred norm

    if project_out:
        # Fused per-head output projection; accumulate across heads (no concat).
        heads = lax.dot_general(pv.astype(compute_dtype), wout_ref[...], dn_proj,
                                preferred_element_type=jnp.float32)  # (H, N, D)
        out = bout_ref[...]                      # bias read once; broadcasts on add
        for h in range(H):                       # small static H; plain VPU adds
            out = out + heads[h]
        # Dropout: identity at inference time (see TODO at top of file).
    else:
        out = pv[0]          # project_out is False only when H == 1 and d == D

    o_ref[...] = out.astype(o_ref.dtype)


def attention_forward(x, w_qkv, w_out=None, b_out=None, *, head_cnt, head_dim,
                      dropout=0.0, compute_dtype=None):
    """Fused Attention forward.

    x: (B, N, input_dim); w_qkv: (input_dim, 3*inner) with columns [Q | K | V];
    w_out: (inner, input_dim); b_out: (input_dim,).
    NOTE: dropout is an inference-time identity (documented TODO)."""
    del dropout
    B, N, D = x.shape
    H, d = head_cnt, head_dim
    inner = H * d
    project_out = not (H == 1 and d == D)
    out_dtype = x.dtype
    if compute_dtype is None:
        compute_dtype = x.dtype

    assert w_qkv.shape == (D, 3 * inner)

    scale = float(d) ** -0.5

    # One-time wrapper-side weight re-layout:
    #   * fold the softmax scale into the Q projection columns,
    #   * split Q/K/V into head-major (H, D, d) so the kernel runs head-batched
    #     dot_generals with no in-kernel slicing / transposes.
    def head_major(w):  # (D, H*d) -> (H, D, d)
        return jnp.transpose(w.reshape(D, H, d), (1, 0, 2)).astype(compute_dtype)

    wq = head_major(w_qkv[:, :inner] * scale)
    wk = head_major(w_qkv[:, inner:2 * inner])
    wv = head_major(w_qkv[:, 2 * inner:])
    x_c = x.astype(compute_dtype)

    # Grid-invariant operands: resident, single-buffered.
    def resident(shape):
        return pl.BlockSpec(shape, lambda b: (0,) * len(shape),
                            pipeline_mode=pl.Buffered(1))

    args = [x_c, wq, wk, wv]
    in_specs = [
        pl.BlockSpec((None, N, D), lambda b: (b, 0, 0)),   # x[b], batch squeezed
        resident((H, D, d)), resident((H, D, d)), resident((H, D, d)),
    ]
    if project_out:
        assert w_out.shape == (inner, D) and b_out.shape == (D,)
        wout = w_out.reshape(H, d, D).astype(compute_dtype)   # per-head out proj
        bout = b_out.reshape(1, D).astype(jnp.float32)
        args += [wout, bout]
        in_specs += [resident((H, d, D)), resident((1, D))]

    kernel = partial(_attention_kernel, project_out=project_out,
                     compute_dtype=compute_dtype)

    return pl.pallas_call(
        kernel,
        out_shape=jax.ShapeDtypeStruct((B, N, D), out_dtype),
        grid_spec=pltpu.PrefetchScalarGridSpec(
            num_scalar_prefetch=0,
            grid=(B,),
            in_specs=in_specs,
            out_specs=pl.BlockSpec((None, N, D), lambda b: (b, 0, 0)),
        ),
        compiler_params=pltpu.CompilerParams(
            dimension_semantics=("parallel",),     # v7x: shard batch over 2 TCs
            vmem_limit_bytes=_vmem_limit_bytes(),
        ),
    )(*args)


def init_attention_params(key, input_dim, head_dim, head_cnt, dtype=jnp.float32):
    """nn.Linear-style uniform(+-1/sqrt(fan_in)) init; weights pre-transposed to
    (in_features, out_features)."""
    inner = head_cnt * head_dim
    k1, k2, k3 = jax.random.split(key, 3)
    bq = 1.0 / math.sqrt(input_dim)
    w_qkv = jax.random.uniform(k1, (input_dim, 3 * inner), dtype, -bq, bq)
    bo = 1.0 / math.sqrt(inner)
    w_out = jax.random.uniform(k2, (inner, input_dim), dtype, -bo, bo)
    b_out = jax.random.uniform(k3, (input_dim,), dtype, -bo, bo)
    return w_qkv, w_out, b_out


def attention_reference(x, w_qkv, w_out, b_out, *, head_cnt, head_dim):
    """Pure-JAX reference mirroring the PyTorch Attention.forward."""
    B, N, D = x.shape
    inner = head_cnt * head_dim
    qkv = x @ w_qkv                                        # (B, N, 3*inner)
    q, k, v = jnp.split(qkv, 3, axis=-1)
    to_heads = lambda t: t.reshape(B, N, head_cnt, head_dim).transpose(0, 2, 1, 3)
    q, k, v = map(to_heads, (q, k, v))                     # (B, H, N, d)
    dots = jnp.einsum('bhid,bhjd->bhij', q, k) * (head_dim ** -0.5)
    att = jax.nn.softmax(dots, axis=-1)
    out = jnp.einsum('bhij,bhjd->bhid', att, v)
    out = out.transpose(0, 2, 1, 3).reshape(B, N, inner)   # 'b h n d -> b n (h d)'
    if not (head_cnt == 1 and head_dim == D):
        out = out @ w_out + b_out                          # Dropout = identity (eval)
    return out


if __name__ == "__main__":
    key = jax.random.PRNGKey(0)
    kx, kp = jax.random.split(key)

    # Small but lane-dense demo shapes: batch=2, tokens=16, input_dim=128,
    # head_dim=32, head_cnt=4 -> inner_dim = 128.
    B, N, D = 2, 16, 128
    head_dim, head_cnt = 32, 4
    dropout = 0.1  # inference-mode identity

    x = jax.random.normal(kx, (B, N, D), dtype=jnp.float32)
    w_qkv, w_out, b_out = init_attention_params(kp, D, head_dim, head_cnt)

    ref = attention_reference(x, w_qkv, w_out, b_out,
                              head_cnt=head_cnt, head_dim=head_dim)

    # f32 MXU path (tight check; approx reciprocal adds ~1e-4 relative error).
    out = attention_forward(x, w_qkv, w_out, b_out,
                            head_cnt=head_cnt, head_dim=head_dim,
                            dropout=dropout)
    out = jax.block_until_ready(out)
    assert out.shape == (B, N, D)
    diff = float(jnp.max(jnp.abs(out - ref)))
    assert jnp.allclose(out, ref, atol=3e-3, rtol=3e-3), \
        f"f32 path mismatch vs reference: max abs diff = {diff}"

    # bf16 MXU path (bf16 operands, f32 accumulation) per perf review.
    out_bf16 = attention_forward(x, w_qkv, w_out, b_out,
                                 head_cnt=head_cnt, head_dim=head_dim,
                                 dropout=dropout, compute_dtype=jnp.bfloat16)
    out_bf16 = jax.block_until_ready(out_bf16)
    diff16 = float(jnp.max(jnp.abs(out_bf16 - ref)))
    assert jnp.allclose(out_bf16, ref, atol=5e-2, rtol=5e-2), \
        f"bf16 path mismatch vs reference: max abs diff = {diff16}"

    print("KERNEL_OK")
</pallas_src>

<mosaic_0001>
module attributes {stable_mosaic.version = 11 : i64} {
  func.func @_attention_kernel(%arg0: i32, %arg1: memref<1x16x128xf32, #tpu.memory_space<vmem>>, %arg2: memref<4x128x32xf32, #tpu.memory_space<vmem>>, %arg3: memref<4x128x32xf32, #tpu.memory_space<vmem>>, %arg4: memref<4x128x32xf32, #tpu.memory_space<vmem>>, %arg5: memref<4x32x128xf32, #tpu.memory_space<vmem>>, %arg6: memref<1x128xf32, #tpu.memory_space<vmem>>, %arg7: memref<1x16x128xf32, #tpu.memory_space<vmem>>) attributes {dimension_semantics = [#tpu.dimension_semantics<parallel>], iteration_bounds = array<i64: 2>, scalar_prefetch = 0 : i64, scratch_operands = 0 : i64, tpu.core_type = #tpu.core_type<tc>, window_params = [{transform_indices = @transform_0, window_bounds = array<i64: 1, 16, 128>}, {pipeline_mode = #tpu.pipeline_mode<synchronous>, transform_indices = @transform_1, window_bounds = array<i64: 4, 128, 32>}, {pipeline_mode = #tpu.pipeline_mode<synchronous>, transform_indices = @transform_2, window_bounds = array<i64: 4, 128, 32>}, {pipeline_mode = #tpu.pipeline_mode<synchronous>, transform_indices = @transform_3, window_bounds = array<i64: 4, 128, 32>}, {pipeline_mode = #tpu.pipeline_mode<synchronous>, transform_indices = @transform_4, window_bounds = array<i64: 4, 32, 128>}, {pipeline_mode = #tpu.pipeline_mode<synchronous>, transform_indices = @transform_5, window_bounds = array<i64: 1, 128>}, {transform_indices = @transform_6, window_bounds = array<i64: 1, 16, 128>}]} {
    %c0 = arith.constant 0 : index
    %c0_0 = arith.constant 0 : index
    %c0_1 = arith.constant 0 : index
    %0 = vector.load %arg1[%c0, %c0_0, %c0_1] : memref<1x16x128xf32, #tpu.memory_space<vmem>>, vector<1x16x128xf32>
    %1 = vector.shape_cast %0 : vector<1x16x128xf32> to vector<16x128xf32>
    %2 = vector.shape_cast %1 : vector<16x128xf32> to vector<1x16x128xf32>
    %3 = vector.broadcast %2 : vector<1x16x128xf32> to vector<4x16x128xf32>
    %c0_2 = arith.constant 0 : index
    %c0_3 = arith.constant 0 : index
    %c0_4 = arith.constant 0 : index
    %4 = vector.load %arg2[%c0_2, %c0_3, %c0_4] : memref<4x128x32xf32, #tpu.memory_space<vmem>>, vector<4x128x32xf32>
    %cst = arith.constant dense<0.000000e+00> : vector<4x16x32xf32>
    %5 = tpu.matmul %3, %4, %cst {dimension_numbers = #tpu.dot_dimension_numbers<[2], [1], [1], [2], [0, 0, 0, 1, 1, 2], [0], [0]>} : vector<4x16x128xf32>, vector<4x128x32xf32>, vector<4x16x32xf32> -> vector<4x16x32xf32>
    %c0_5 = arith.constant 0 : index
    %c0_6 = arith.constant 0 : index
    %c0_7 = arith.constant 0 : index
    %6 = vector.load %arg3[%c0_5, %c0_6, %c0_7] : memref<4x128x32xf32, #tpu.memory_space<vmem>>, vector<4x128x32xf32>
    %cst_8 = arith.constant dense<0.000000e+00> : vector<4x16x32xf32>
    %7 = tpu.matmul %3, %6, %cst_8 {dimension_numbers = #tpu.dot_dimension_numbers<[2], [1], [1], [2], [0, 0, 0, 1, 1, 2], [0], [0]>} : vector<4x16x128xf32>, vector<4x128x32xf32>, vector<4x16x32xf32> -> vector<4x16x32xf32>
    %c0_9 = arith.constant 0 : index
    %c0_10 = arith.constant 0 : index
    %c0_11 = arith.constant 0 : index
    %8 = vector.load %arg4[%c0_9, %c0_10, %c0_11] : memref<4x128x32xf32, #tpu.memory_space<vmem>>, vector<4x128x32xf32>
    %cst_12 = arith.constant dense<0.000000e+00> : vector<4x16x32xf32>
    %9 = tpu.matmul %3, %8, %cst_12 {dimension_numbers = #tpu.dot_dimension_numbers<[2], [1], [1], [2], [0, 0, 0, 1, 1, 2], [0], [0]>} : vector<4x16x128xf32>, vector<4x128x32xf32>, vector<4x16x32xf32> -> vector<4x16x32xf32>
    %cst_13 = arith.constant dense<0.000000e+00> : vector<4x16x16xf32>
    %10 = tpu.matmul %5, %7, %cst_13 {dimension_numbers = #tpu.dot_dimension_numbers<[2], [2], [1], [1], [0, 0, 0, 1, 1, 1], [0], [0]>} : vector<4x16x32xf32>, vector<4x16x32xf32>, vector<4x16x16xf32> -> vector<4x16x16xf32>
    %cst_14 = arith.constant dense<0xFF800000> : vector<4x16xf32>
    %11 = vector.multi_reduction <maximumf>, %10, %cst_14 [2] : vector<4x16x16xf32> to vector<4x16xf32>
    %12 = vector.shape_cast %11 : vector<4x16xf32> to vector<4x16x1xf32>
    %13 = vector.broadcast %12 : vector<4x16x1xf32> to vector<4x16x16xf32>
    %14 = arith.subf %10, %13 : vector<4x16x16xf32>
    %15 = math.exp %14 : vector<4x16x16xf32>
    %cst_15 = arith.constant dense<0.000000e+00> : vector<4x16xf32>
    %16 = vector.multi_reduction <add>, %15, %cst_15 [2] : vector<4x16x16xf32> to vector<4x16xf32>
    %17 = vector.shape_cast %16 : vector<4x16xf32> to vector<4x16x1xf32>
    %cst_16 = arith.constant dense<0.000000e+00> : vector<4x16x32xf32>
    %18 = tpu.matmul %15, %9, %cst_16 {dimension_numbers = #tpu.dot_dimension_numbers<[2], [1], [1], [2], [0, 0, 0, 1, 1, 2], [0], [0]>} : vector<4x16x16xf32>, vector<4x16x32xf32>, vector<4x16x32xf32> -> vector<4x16x32xf32>
    %19 = tpu.reciprocal %17 {approx = true} : vector<4x16x1xf32> -> vector<4x16x1xf32>
    %20 = vector.broadcast %19 : vector<4x16x1xf32> to vector<4x16x32xf32>
    %21 = arith.mulf %18, %20 : vector<4x16x32xf32>
    %c0_17 = arith.constant 0 : index
    %c0_18 = arith.constant 0 : index
    %c0_19 = arith.constant 0 : index
    %22 = vector.load %arg5[%c0_17, %c0_18, %c0_19] : memref<4x32x128xf32, #tpu.memory_space<vmem>>, vector<4x32x128xf32>
    %cst_20 = arith.constant dense<0.000000e+00> : vector<4x16x128xf32>
    %23 = tpu.matmul %21, %22, %cst_20 {dimension_numbers = #tpu.dot_dimension_numbers<[2], [1], [1], [2], [0, 0, 0, 1, 1, 2], [0], [0]>} : vector<4x16x32xf32>, vector<4x32x128xf32>, vector<4x16x128xf32> -> vector<4x16x128xf32>
    %c0_21 = arith.constant 0 : index
    %c0_22 = arith.constant 0 : index
    %24 = vector.load %arg6[%c0_21, %c0_22] : memref<1x128xf32, #tpu.memory_space<vmem>>, vector<1x128xf32>
    %25 = vector.extract_strided_slice %23 {offsets = [0, 0, 0], sizes = [1, 16, 128], strides = [1, 1, 1]} : vector<4x16x128xf32> to vector<1x16x128xf32>
    %26 = vector.shape_cast %25 : vector<1x16x128xf32> to vector<16x128xf32>
    %27 = vector.broadcast %24 : vector<1x128xf32> to vector<16x128xf32>
    %28 = arith.addf %27, %26 : vector<16x128xf32>
    %29 = vector.extract_strided_slice %23 {offsets = [1, 0, 0], sizes = [1, 16, 128], strides = [1, 1, 1]} : vector<4x16x128xf32> to vector<1x16x128xf32>
    %30 = vector.shape_cast %29 : vector<1x16x128xf32> to vector<16x128xf32>
    %31 = arith.addf %28, %30 : vector<16x128xf32>
    %32 = vector.extract_strided_slice %23 {offsets = [2, 0, 0], sizes = [1, 16, 128], strides = [1, 1, 1]} : vector<4x16x128xf32> to vector<1x16x128xf32>
    %33 = vector.shape_cast %32 : vector<1x16x128xf32> to vector<16x128xf32>
    %34 = arith.addf %31, %33 : vector<16x128xf32>
    %35 = vector.extract_strided_slice %23 {offsets = [3, 0, 0], sizes = [1, 16, 128], strides = [1, 1, 1]} : vector<4x16x128xf32> to vector<1x16x128xf32>
    %36 = vector.shape_cast %35 : vector<1x16x128xf32> to vector<16x128xf32>
    %37 = arith.addf %34, %36 : vector<16x128xf32>
    %c0_23 = arith.constant 0 : index
    %c0_24 = arith.constant 0 : index
    %c0_25 = arith.constant 0 : index
    %38 = vector.load %arg7[%c0_23, %c0_24, %c0_25] : memref<1x16x128xf32, #tpu.memory_space<vmem>>, vector<1x16x128xf32>
    %39 = vector.shape_cast %38 : vector<1x16x128xf32> to vector<16x128xf32>
    %40 = vector.shape_cast %37 : vector<16x128xf32> to vector<1x16x128xf32>
    tpu.vector_store %arg7[%c0_23, %c0_24, %c0_25], %40 {strides = array<i32>} : memref<1x16x128xf32, #tpu.memory_space<vmem>>, vector<1x16x128xf32>,
    return
  }
  func.func @transform_0(%arg0: i32) -> (i32, i32, i32) {
    %c0_i32 = arith.constant 0 : i32
    %c0_i32_0 = arith.constant 0 : i32
    %c0_i32_1 = arith.constant 0 : i32
    return %arg0, %c0_i32, %c0_i32_0 : i32, i32, i32
  }
  func.func @transform_1(%arg0: i32) -> (i32, i32, i32) {
    %c0_i32 = arith.constant 0 : i32
    %c0_i32_0 = arith.constant 0 : i32
    %c0_i32_1 = arith.constant 0 : i32
    %c0_i32_2 = arith.constant 0 : i32
    return %c0_i32, %c0_i32_0, %c0_i32_1 : i32, i32, i32
  }
  func.func @transform_2(%arg0: i32) -> (i32, i32, i32) {
    %c0_i32 = arith.constant 0 : i32
    %c0_i32_0 = arith.constant 0 : i32
    %c0_i32_1 = arith.constant 0 : i32
    %c0_i32_2 = arith.constant 0 : i32
    return %c0_i32, %c0_i32_0, %c0_i32_1 : i32, i32, i32
  }
  func.func @transform_3(%arg0: i32) -> (i32, i32, i32) {
    %c0_i32 = arith.constant 0 : i32
    %c0_i32_0 = arith.constant 0 : i32
    %c0_i32_1 = arith.constant 0 : i32
    %c0_i32_2 = arith.constant 0 : i32
    return %c0_i32, %c0_i32_0, %c0_i32_1 : i32, i32, i32
  }
  func.func @transform_4(%arg0: i32) -> (i32, i32, i32) {
    %c0_i32 = arith.constant 0 : i32
    %c0_i32_0 = arith.constant 0 : i32
    %c0_i32_1 = arith.constant 0 : i32
    %c0_i32_2 = arith.constant 0 : i32
    return %c0_i32, %c0_i32_0, %c0_i32_1 : i32, i32, i32
  }
  func.func @transform_5(%arg0: i32) -> (i32, i32) {
    %c0_i32 = arith.constant 0 : i32
    %c0_i32_0 = arith.constant 0 : i32
    %c0_i32_1 = arith.constant 0 : i32
    return %c0_i32, %c0_i32_0 : i32, i32
  }
  func.func @transform_6(%arg0: i32) -> (i32, i32, i32) {
    %c0_i32 = arith.constant 0 : i32
    %c0_i32_0 = arith.constant 0 : i32
    %c0_i32_1 = arith.constant 0 : i32
    return %arg0, %c0_i32, %c0_i32_0 : i32, i32, i32
  }
}

</mosaic_0001>

<bundles_post_ra>
// kernel: tpu_custom_call.1
= control target key start
LH: loop header
LB: loop body
LE: loop exit
PB: predicated region body
PF: predicated region fallthrough
CT: control target
= control target key end

     0   :  { %11 = vsyncpa [#allocation3], 0  ;;  %s2308_s0 = inlined_call_operand.vmem [shape: f32[2,16,128], index: 0, kind: input, shape index: {}]   ;;  %s2309_s1 = inlined_call_operand.vmem [shape: f32[4,128,32], index: 1, kind: input, shape index: {}]   ;;  %s2310_s2 = inlined_call_operand.vmem [shape: f32[4,128,32], index: 2, kind: input, shape index: {}]   ;;  %s2311_s3 = inlined_call_operand.vmem [shape: f32[4,128,32], index: 3, kind: input, shape index: {}]   ;;  %s2312_s4 = inlined_call_operand.vmem [shape: f32[4,32,128], index: 4, kind: input, shape index: {}]   ;;  %s2313_s5 = inlined_call_operand.vmem [shape: f32[1,128], index: 5, kind: input, shape index: {}]   ;;  %s2314_s6 = inlined_call_operand.hbm [shape: f32[2,16,128], index: 6, kind: output, shape index: {}]  }
   0x1   :  { %13 = vsyncpa [#allocation3 + $0x1], 0  ;;  %s1511_s21 = smov 0   ;;  %s1513_s22 = smov 0  }
   0x2   :  { %s1515_s23 = smov 0   ;;  %s1517_s24 = smov 0  }
   0x3 LB: > { %s1532_s25 = sadd.s32 4294967295, %s1472_s24   ;;  %s1290_s26 = sadd.s32 4294967294, %s1472_s24   ;;  %s1472_s24 = sphi %s1517_s24, %s2320_s24   ;;  %s1468_s23 = sphi %s1515_s23, %s2319_s23   ;;  %s1464_s22 = sphi %s1513_s22, %s2318_s22   ;;  %s1460_s21 = sphi %s1511_s21, %s2317_s21  }
   0x4   : > { %s1536_s27 = sadd.s32 1, %s1472_s24   ;;  %s157_s28 = sadd.s32 1, %s1468_s23 }
   0x5   : > { %s154_s29 = ssub.s32 %s1472_s24, %s1536_s27  ;;  %p167_p0 = scmp.ne.s32.totalorder %s1468_s23, %s1464_s22 }
   0x6   : > { %p155_p1 = scmp.eq.s32.totalorder %s154_s29, 0  ;;  %p168_p2 = scmp.eq.s32.totalorder %s1532_s25, 1 }
   0x7   : > { %p173_p3 = scmp.ne.s32.totalorder %s1464_s22, %s1460_s21  ;;  %p174_p4 = scmp.eq.s32.totalorder %s1290_s26, 1 }
   0x8   : > { %s1547_s30 = scalar_select %p155_p1, %s1468_s23, %s157_s28  }
   0x9   : > { %p1549_p5 = por %p168_p2, %p167_p0  ;;  %p1553_p6 = por %p174_p4, %p173_p3 }
   0xa   : > { %p1293_p7 = scmp.ge.s32.totalorder %s1472_s24, 1  ;;  %p215_p8 = scmp.lt.s32.totalorder %s1472_s24, 3 }
   0xc   : > { %p216_p9 = pnand %p1293_p7, %p215_p8 }
   0xd   : > { %p245_p10 = scmp.lt.s32.totalorder (!%p216_p9), %s1532_s25, 1  ;;  %s242_s14 = sand.u32 (!%p216_p9), 1, %s1464_s22  }
   0xe   : > { %219 = sbr.rel (%p216_p9) target bundleno = 785 (0x311), region = 44  ;;  %s1294_s16 = sshll.u32 (!%p216_p9), %s242_s14, 4 }
   0xf   : > { %s1335_s17 = sshll.u32 (!%p216_p9), %s1532_s25, 4  ;;  %s244_s20 = scalar_lea.vmem (!%p216_p9), [#allocation2], %s1294_s16 }
  0x10   : > { %s1224_s29 = scalar_lea.hbm (!%p216_p9), %s2314_s6, %s1335_s17  ;;  %s1430_s12 = scalar_lea.hbm (!%p216_p9), %s2314_s6, 32 }
  0x11   : > { %s1227_s9 = sshll.u32 (!%p216_p9), %s1224_s29, 4  ;;  %s1228_s9 = int_to_ptr.hbm [resolvable:$true] %s1227_s9 }
  0x12   : > { %s1424_s10 = sshra.s32 (!%p216_p9), %s1228_s9, 4  ;;  %s1425_s10 = int_to_ptr.hbm [resolvable:$true] %s1424_s10 }
  0x13   : > { %v267_v0 = vld [vmem:[%s2309_s1 + $0x78] sm:$0xff]  ;;  %v266_v4 = vld [vmem:[%s2309_s1 + $0x70] sm:$0xff]  ;;  %v265_v8 = vld [vmem:[%s2309_s1 + $0x68] sm:$0xff]  ;;  %s1797_s15 = scalar_select %p245_p10, %s1532_s25, 1  ;;  %vm720_vm0 = vcmask 261120   ;;  %vm861_vm1 = vcmask 130048  }
  0x14   : > { %v283_v1 = vld [vmem:[%s2309_s1 + $0xf8] sm:$0xff]  ;;  %316 = vmatpush.msra.mxu0 %v267_v0  ;;  %v282_v5 = vld [vmem:[%s2309_s1 + $0xf0] sm:$0xff]  ;;  %v281_v9 = vld [vmem:[%s2309_s1 + $0xe8] sm:$0xff]  ;;  %s1213_s25 = scalar_lea.sflag [#allocation3], %s242_s14  ;;  %s1426_s11 = scalar_lea.hbm %s1425_s10, 16 }
  0x15   : > { %v299_v2 = vld [vmem:[%s2309_s1 + $0x178] sm:$0xff]  ;;  %339 = vmatpush.msra.mxu1 %v283_v1  ;;  %v298_v6 = vld [vmem:[%s2309_s1 + $0x170] sm:$0xff]  ;;  %v297_v10 = vld [vmem:[%s2309_s1 + $0x168] sm:$0xff]  ;;  %s1334_s18 = sshll.u32 %s1797_s15, 4  ;;  %p1427_p11 = scmp.ne.s32.totalorder %s1425_s10, %s1426_s11 }
  0x16   : > { %v315_v3 = vld [vmem:[%s2309_s1 + $0x1f8] sm:$0xff]  ;;  %362 = vmatpush.msra.mxu2 %v299_v2  ;;  %v314_v7 = vld [vmem:[%s2309_s1 + $0x1f0] sm:$0xff]  ;;  %317 = vmatpush.msra.mxu0 %v266_v4  ;;  %v313_v11 = vld [vmem:[%s2309_s1 + $0x1e8] sm:$0xff]  ;;  %s1845_s19 = scalar_lea.vmem %s2308_s0, %s1334_s18  ;;  %p1431_p0 = scmp.lt.s32.totalorder %s1425_s10, %s2314_s6 }
  0x17   : > { %385 = vmatpush.msra.mxu3 %v315_v3  ;;  %340 = vmatpush.msra.mxu1 %v282_v5  ;;  %v264_v12 = vld [vmem:[%s2309_s1 + $0x60] sm:$0xff]  ;;  %v263_v16 = vld [vmem:[%s2309_s1 + $0x58] sm:$0xff]  ;;  %v262_v20 = vld [vmem:[%s2309_s1 + $0x50] sm:$0xff]  ;;  %p1428_p12 = pnand %p1427_p11, %p1549_p5  ;;  %p1432_p1 = scmp.lt.s32.totalorder %s1430_s12, %s1426_s11 }
  0x18   : > { %363 = vmatpush.msra.mxu2 %v298_v6  ;;  %v280_v13 = vld [vmem:[%s2309_s1 + $0xe0] sm:$0xff]  ;;  %318 = vmatpush.msra.mxu0 %v265_v8  ;;  %v279_v17 = vld [vmem:[%s2309_s1 + $0xd8] sm:$0xff]  ;;  %v278_v21 = vld [vmem:[%s2309_s1 + $0xd0] sm:$0xff] }
  0x19   : > { %386 = vmatpush.msra.mxu3 %v314_v7  ;;  %341 = vmatpush.msra.mxu1 %v281_v9  ;;  %v296_v14 = vld [vmem:[%s2309_s1 + $0x160] sm:$0xff]  ;;  %v295_v18 = vld [vmem:[%s2309_s1 + $0x158] sm:$0xff]  ;;  %v294_v22 = vld [vmem:[%s2309_s1 + $0x150] sm:$0xff]  ;;  %p1429_p13 = pneg %p1428_p12  ;;  %p1433_p2 = por %p1432_p1, %p1431_p0 }
  0x1a   : > { %v312_v15 = vld [vmem:[%s2309_s1 + $0x1e0] sm:$0xff]  ;;  %364 = vmatpush.msra.mxu2 %v297_v10  ;;  %319 = vmatpush.msra.mxu0 %v264_v12  ;;  %v311_v19 = vld [vmem:[%s2309_s1 + $0x1d8] sm:$0xff]  ;;  %v310_v23 = vld [vmem:[%s2309_s1 + $0x1d0] sm:$0xff] }
  0x1b   : > { %387 = vmatpush.msra.mxu3 %v313_v11  ;;  %342 = vmatpush.msra.mxu1 %v280_v13  ;;  %v261_v24 = vld [vmem:[%s2309_s1 + $0x48] sm:$0xff]  ;;  %v260_v28 = vld [vmem:[%s2309_s1 + $0x40] sm:$0xff]  ;;  %v259_v32 = vld [vmem:[%s2309_s1 + $0x38] sm:$0xff]  ;;  %p1434_p3 = pnand %p1433_p2, %p1429_p13 }
  0x1c   : > { %365 = vmatpush.msra.mxu2 %v296_v14  ;;  %320 = vmatpush.msra.mxu0 %v263_v16  ;;  %v277_v25 = vld [vmem:[%s2309_s1 + $0xc8] sm:$0xff]  ;;  %v276_v29 = vld [vmem:[%s2309_s1 + $0xc0] sm:$0xff]  ;;  %v275_v33 = vld [vmem:[%s2309_s1 + $0xb8] sm:$0xff] }
  0x1d   : > { %388 = vmatpush.msra.mxu3 %v312_v15  ;;  %343 = vmatpush.msra.mxu1 %v279_v17  ;;  %v293_v26 = vld [vmem:[%s2309_s1 + $0x148] sm:$0xff]  ;;  %v292_v30 = vld [vmem:[%s2309_s1 + $0x140] sm:$0xff]  ;;  %v291_v34 = vld [vmem:[%s2309_s1 + $0x138] sm:$0xff] }
  0x1e   : > { %366 = vmatpush.msra.mxu2 %v295_v18  ;;  %321 = vmatpush.msra.mxu0 %v262_v20  ;;  %v309_v27 = vld [vmem:[%s2309_s1 + $0x1c8] sm:$0xff]  ;;  %v308_v31 = vld [vmem:[%s2309_s1 + $0x1c0] sm:$0xff]  ;;  %v307_v35 = vld [vmem:[%s2309_s1 + $0x1b8] sm:$0xff] }
  0x1f   : > { %389 = vmatpush.msra.mxu3 %v311_v19  ;;  %344 = vmatpush.msra.mxu1 %v278_v21  ;;  %v258_v36 = vld [vmem:[%s2309_s1 + $0x30] sm:$0xff]  ;;  %v257_v40 = vld [vmem:[%s2309_s1 + $0x28] sm:$0xff]  ;;  %v256_v44 = vld [vmem:[%s2309_s1 + $0x20] sm:$0xff] }
  0x20   : > { %367 = vmatpush.msra.mxu2 %v294_v22  ;;  %322 = vmatpush.msra.mxu0 %v261_v24  ;;  %v274_v37 = vld [vmem:[%s2309_s1 + $0xb0] sm:$0xff]  ;;  %v273_v41 = vld [vmem:[%s2309_s1 + $0xa8] sm:$0xff]  ;;  %v272_v45 = vld [vmem:[%s2309_s1 + $0xa0] sm:$0xff] }
  0x21   : > { %390 = vmatpush.msra.mxu3 %v310_v23  ;;  %345 = vmatpush.msra.mxu1 %v277_v25  ;;  %v290_v38 = vld [vmem:[%s2309_s1 + $0x130] sm:$0xff]  ;;  %v289_v42 = vld [vmem:[%s2309_s1 + $0x128] sm:$0xff]  ;;  %v288_v46 = vld [vmem:[%s2309_s1 + $0x120] sm:$0xff] }
  0x22   : > { %368 = vmatpush.msra.mxu2 %v293_v26  ;;  %323 = vmatpush.msra.mxu0 %v260_v28  ;;  %v306_v39 = vld [vmem:[%s2309_s1 + $0x1b0] sm:$0xff]  ;;  %v305_v43 = vld [vmem:[%s2309_s1 + $0x1a8] sm:$0xff]  ;;  %v304_v47 = vld [vmem:[%s2309_s1 + $0x1a0] sm:$0xff] }
  0x23   : > { %391 = vmatpush.msra.mxu3 %v309_v27  ;;  %346 = vmatpush.msra.mxu1 %v276_v29  ;;  %v255_v48 = vld [vmem:[%s2309_s1 + $0x18] sm:$0xff]  ;;  %v254_v52 = vld [vmem:[%s2309_s1 + $0x10] sm:$0xff]  ;;  %v253_v56 = vld [vmem:[%s2309_s1 + $0x8] sm:$0xff] }
  0x24   : > { %369 = vmatpush.msra.mxu2 %v292_v30  ;;  %324 = vmatpush.msra.mxu0 %v259_v32  ;;  %v271_v49 = vld [vmem:[%s2309_s1 + $0x98] sm:$0xff]  ;;  %v270_v53 = vld [vmem:[%s2309_s1 + $0x90] sm:$0xff]  ;;  %v269_v57 = vld [vmem:[%s2309_s1 + $0x88] sm:$0xff] }
  0x25   : > { %392 = vmatpush.msra.mxu3 %v308_v31  ;;  %347 = vmatpush.msra.mxu1 %v275_v33  ;;  %v287_v50 = vld [vmem:[%s2309_s1 + $0x118] sm:$0xff]  ;;  %v286_v54 = vld [vmem:[%s2309_s1 + $0x110] sm:$0xff]  ;;  %v285_v58 = vld [vmem:[%s2309_s1 + $0x108] sm:$0xff] }
  0x26   : > { %370 = vmatpush.msra.mxu2 %v291_v34  ;;  %325 = vmatpush.msra.mxu0 %v258_v36  ;;  %v303_v51 = vld [vmem:[%s2309_s1 + $0x198] sm:$0xff]  ;;  %v302_v55 = vld [vmem:[%s2309_s1 + $0x190] sm:$0xff]  ;;  %v301_v59 = vld [vmem:[%s2309_s1 + $0x188] sm:$0xff] }
  0x27   : > { %393 = vmatpush.msra.mxu3 %v307_v35  ;;  %348 = vmatpush.msra.mxu1 %v274_v37  ;;  %v252_v60 = vld [vmem:[%s2309_s1] sm:$0xff]  ;;  %v423_v0 = vld [vmem:[%s2310_s2 + $0x78] sm:$0xff]  ;;  %v422_v4 = vld [vmem:[%s2310_s2 + $0x70] sm:$0xff] }
  0x28   : > { %371 = vmatpush.msra.mxu2 %v290_v38  ;;  %326 = vmatpush.msra.mxu0 %v257_v40  ;;  %v268_v61 = vld [vmem:[%s2309_s1 + $0x80] sm:$0xff]  ;;  %v439_v1 = vld [vmem:[%s2310_s2 + $0xf8] sm:$0xff]  ;;  %v438_v5 = vld [vmem:[%s2310_s2 + $0xf0] sm:$0xff] }
  0x29   : > { %394 = vmatpush.msra.mxu3 %v306_v39  ;;  %349 = vmatpush.msra.mxu1 %v273_v41  ;;  %v284_v62 = vld [vmem:[%s2309_s1 + $0x100] sm:$0xff]  ;;  %v455_v2 = vld [vmem:[%s2310_s2 + $0x178] sm:$0xff]  ;;  %v454_v6 = vld [vmem:[%s2310_s2 + $0x170] sm:$0xff] }
  0x2a   : > { %372 = vmatpush.msra.mxu2 %v289_v42  ;;  %327 = vmatpush.msra.mxu0 %v256_v44  ;;  %v300_v63 = vld [vmem:[%s2309_s1 + $0x180] sm:$0xff]  ;;  %v471_v3 = vld [vmem:[%s2310_s2 + $0x1f8] sm:$0xff]  ;;  %v470_v7 = vld [vmem:[%s2310_s2 + $0x1f0] sm:$0xff] }
  0x2b   : > { %395 = vmatpush.msra.mxu3 %v305_v43  ;;  %350 = vmatpush.msra.mxu1 %v272_v45  ;;  %v421_v8 = vld [vmem:[%s2310_s2 + $0x68] sm:$0xff]  ;;  %v420_v12 = vld [vmem:[%s2310_s2 + $0x60] sm:$0xff]  ;;  %v419_v16 = vld [vmem:[%s2310_s2 + $0x58] sm:$0xff] }
  0x2c   : > { %373 = vmatpush.msra.mxu2 %v288_v46  ;;  %328 = vmatpush.msra.mxu0 %v255_v48  ;;  %v437_v9 = vld [vmem:[%s2310_s2 + $0xe8] sm:$0xff]  ;;  %v436_v13 = vld [vmem:[%s2310_s2 + $0xe0] sm:$0xff]  ;;  %v435_v17 = vld [vmem:[%s2310_s2 + $0xd8] sm:$0xff] }
  0x2d   : > { %396 = vmatpush.msra.mxu3 %v304_v47  ;;  %351 = vmatpush.msra.mxu1 %v271_v49  ;;  %v453_v10 = vld [vmem:[%s2310_s2 + $0x168] sm:$0xff]  ;;  %v452_v14 = vld [vmem:[%s2310_s2 + $0x160] sm:$0xff]  ;;  %v451_v18 = vld [vmem:[%s2310_s2 + $0x158] sm:$0xff] }
  0x2e   : > { %374 = vmatpush.msra.mxu2 %v287_v50  ;;  %329 = vmatpush.msra.mxu0 %v254_v52  ;;  %v469_v11 = vld [vmem:[%s2310_s2 + $0x1e8] sm:$0xff]  ;;  %v468_v15 = vld [vmem:[%s2310_s2 + $0x1e0] sm:$0xff]  ;;  %v467_v19 = vld [vmem:[%s2310_s2 + $0x1d8] sm:$0xff] }
  0x2f   : > { %397 = vmatpush.msra.mxu3 %v303_v51  ;;  %352 = vmatpush.msra.mxu1 %v270_v53  ;;  %v418_v20 = vld [vmem:[%s2310_s2 + $0x50] sm:$0xff]  ;;  %v417_v24 = vld [vmem:[%s2310_s2 + $0x48] sm:$0xff]  ;;  %v416_v28 = vld [vmem:[%s2310_s2 + $0x40] sm:$0xff] }
  0x30   : > { %375 = vmatpush.msra.mxu2 %v286_v54  ;;  %330 = vmatpush.msra.mxu0 %v253_v56  ;;  %v434_v21 = vld [vmem:[%s2310_s2 + $0xd0] sm:$0xff]  ;;  %v433_v25 = vld [vmem:[%s2310_s2 + $0xc8] sm:$0xff]  ;;  %v432_v29 = vld [vmem:[%s2310_s2 + $0xc0] sm:$0xff] }
  0x31   : > { %398 = vmatpush.msra.mxu3 %v302_v55  ;;  %353 = vmatpush.msra.mxu1 %v269_v57  ;;  %v450_v22 = vld [vmem:[%s2310_s2 + $0x150] sm:$0xff]  ;;  %v449_v26 = vld [vmem:[%s2310_s2 + $0x148] sm:$0xff]  ;;  %v448_v30 = vld [vmem:[%s2310_s2 + $0x140] sm:$0xff] }
  0x32   : > { %376 = vmatpush.msra.mxu2 %v285_v58  ;;  %331 = vmatpush.msra.mxu0 %v252_v60  ;;  %v466_v23 = vld [vmem:[%s2310_s2 + $0x1d0] sm:$0xff]  ;;  %v465_v27 = vld [vmem:[%s2310_s2 + $0x1c8] sm:$0xff]  ;;  %v464_v31 = vld [vmem:[%s2310_s2 + $0x1c0] sm:$0xff] }
  0x33   : > { %399 = vmatpush.msra.mxu3 %v301_v59  ;;  %354 = vmatpush.msra.mxu1 %v268_v61  ;;  %v1860_v32 = vld [vmem:[%s1845_s19] sm:$0xff]  ;;  %v415_v33 = vld [vmem:[%s2310_s2 + $0x38] sm:$0xff]  ;;  %v414_v37 = vld [vmem:[%s2310_s2 + $0x30] sm:$0xff] }
  0x34   : > { %377 = vmatpush.msra.mxu2 %v284_v62  ;;  %472 = vmatpush.msrb.mxu0 %v423_v0  ;;  %v431_v34 = vld [vmem:[%s2310_s2 + $0xb8] sm:$0xff]  ;;  %v430_v38 = vld [vmem:[%s2310_s2 + $0xb0] sm:$0xff]  ;;  %v413_v41 = vld [vmem:[%s2310_s2 + $0x28] sm:$0xff] }
  0x35   : > { %400 = vmatpush.msra.mxu3 %v300_v63  ;;  %495 = vmatpush.msrb.mxu1 %v439_v1  ;;  %v447_v35 = vld [vmem:[%s2310_s2 + $0x138] sm:$0xff]  ;;  %v446_v39 = vld [vmem:[%s2310_s2 + $0x130] sm:$0xff]  ;;  %v429_v42 = vld [vmem:[%s2310_s2 + $0xa8] sm:$0xff] }
  0x36   : > { %518 = vmatpush.msrb.mxu2 %v455_v2  ;;  %473 = vmatpush.msrb.mxu0 %v422_v4  ;;  %v463_v36 = vld [vmem:[%s2310_s2 + $0x1b8] sm:$0xff]  ;;  %v462_v40 = vld [vmem:[%s2310_s2 + $0x1b0] sm:$0xff]  ;;  %v445_v43 = vld [vmem:[%s2310_s2 + $0x128] sm:$0xff] }
  0x37   : > { %541 = vmatpush.msrb.mxu3 %v471_v3  ;;  %496 = vmatpush.msrb.mxu1 %v438_v5  ;;  %v461_v44 = vld [vmem:[%s2310_s2 + $0x1a8] sm:$0xff]  ;;  %v412_v45 = vld [vmem:[%s2310_s2 + $0x20] sm:$0xff]  ;;  %v411_v50 = vld [vmem:[%s2310_s2 + $0x18] sm:$0xff] }
  0x38   : > { %519 = vmatpush.msrb.mxu2 %v454_v6  ;;  %474 = vmatpush.msrb.mxu0 %v421_v8  ;;  %v428_v46 = vld [vmem:[%s2310_s2 + $0xa0] sm:$0xff]  ;;  %v1915_v49 = vld [vmem:[%s1845_s19 + $0x8] sm:$0xff]  ;;  %v427_v51 = vld [vmem:[%s2310_s2 + $0x98] sm:$0xff]  ;;  %s1225_s19 = sshll.u32 %s244_s20, 4  ;;  %s1226_s19 = int_to_ptr.vmem [resolvable:$true] %s1225_s19 }
  0x39   : > { %542 = vmatpush.msrb.mxu3 %v470_v7  ;;  %497 = vmatpush.msrb.mxu1 %v437_v9  ;;  %v444_v47 = vld [vmem:[%s2310_s2 + $0x120] sm:$0xff]  ;;  %v443_v52 = vld [vmem:[%s2310_s2 + $0x118] sm:$0xff]  ;;  %v410_v54 = vld [vmem:[%s2310_s2 + $0x10] sm:$0xff] }
  0x3a   : > { %520 = vmatpush.msrb.mxu2 %v453_v10  ;;  %475 = vmatpush.msrb.mxu0 %v420_v12  ;;  %v460_v48 = vld [vmem:[%s2310_s2 + $0x1a0] sm:$0xff]  ;;  %v459_v53 = vld [vmem:[%s2310_s2 + $0x198] sm:$0xff]  ;;  %v426_v55 = vld [vmem:[%s2310_s2 + $0x90] sm:$0xff] }
  0x3b   : > { %543 = vmatpush.msrb.mxu3 %v469_v11  ;;  %498 = vmatpush.msrb.mxu1 %v436_v13  ;;  %v442_v56 = vld [vmem:[%s2310_s2 + $0x110] sm:$0xff]  ;;  %v409_v58 = vld [vmem:[%s2310_s2 + $0x8] sm:$0xff]  ;;  %v408_v62 = vld [vmem:[%s2310_s2] sm:$0xff] }
  0x3c   : > { %521 = vmatpush.msrb.mxu2 %v452_v14  ;;  %476 = vmatpush.msrb.mxu0 %v419_v16  ;;  %v458_v57 = vld [vmem:[%s2310_s2 + $0x190] sm:$0xff]  ;;  %v425_v59 = vld [vmem:[%s2310_s2 + $0x88] sm:$0xff]  ;;  %v424_v63 = vld [vmem:[%s2310_s2 + $0x80] sm:$0xff] }
  0x3d   : > { %544 = vmatpush.msrb.mxu3 %v468_v15  ;;  %499 = vmatpush.msrb.mxu1 %v435_v17  ;;  %v441_v60 = vld [vmem:[%s2310_s2 + $0x108] sm:$0xff]  ;;  %v440_v0 = vld [vmem:[%s2310_s2 + $0x100] sm:$0xff]  ;;  %v579_v2 = vld [vmem:[%s2311_s3 + $0x78] sm:$0xff] }
  0x3e   : > { %522 = vmatpush.msrb.mxu2 %v451_v18  ;;  %477 = vmatpush.msrb.mxu0 %v418_v20  ;;  %v457_v61 = vld [vmem:[%s2310_s2 + $0x188] sm:$0xff]  ;;  %v456_v1 = vld [vmem:[%s2310_s2 + $0x180] sm:$0xff]  ;;  %v595_v3 = vld [vmem:[%s2311_s3 + $0xf8] sm:$0xff] }
  0x3f   : > { %545 = vmatpush.msrb.mxu3 %v467_v19  ;;  %500 = vmatpush.msrb.mxu1 %v434_v21  ;;  %v611_v4 = vld [vmem:[%s2311_s3 + $0x178] sm:$0xff]  ;;  %v578_v6 = vld [vmem:[%s2311_s3 + $0x70] sm:$0xff]  ;;  %v577_v10 = vld [vmem:[%s2311_s3 + $0x68] sm:$0xff] }
  0x40   : > { %523 = vmatpush.msrb.mxu2 %v450_v22  ;;  %478 = vmatpush.msrb.mxu0 %v417_v24  ;;  %v627_v5 = vld [vmem:[%s2311_s3 + $0x1f8] sm:$0xff]  ;;  %v594_v7 = vld [vmem:[%s2311_s3 + $0xf0] sm:$0xff]  ;;  %v593_v11 = vld [vmem:[%s2311_s3 + $0xe8] sm:$0xff] }
  0x41   : > { %546 = vmatpush.msrb.mxu3 %v466_v23  ;;  %501 = vmatpush.msrb.mxu1 %v433_v25  ;;  %v610_v8 = vld [vmem:[%s2311_s3 + $0x170] sm:$0xff]  ;;  %v609_v12 = vld [vmem:[%s2311_s3 + $0x168] sm:$0xff]  ;;  %v576_v14 = vld [vmem:[%s2311_s3 + $0x60] sm:$0xff] }
  0x42   : > { %524 = vmatpush.msrb.mxu2 %v449_v26  ;;  %479 = vmatpush.msrb.mxu0 %v416_v28  ;;  %v626_v9 = vld [vmem:[%s2311_s3 + $0x1f0] sm:$0xff]  ;;  %v625_v13 = vld [vmem:[%s2311_s3 + $0x1e8] sm:$0xff]  ;;  %v592_v15 = vld [vmem:[%s2311_s3 + $0xe0] sm:$0xff] }
  0x43   : > { %547 = vmatpush.msrb.mxu3 %v465_v27  ;;  %502 = vmatpush.msrb.mxu1 %v432_v29  ;;  %v608_v16 = vld [vmem:[%s2311_s3 + $0x160] sm:$0xff]  ;;  %v575_v18 = vld [vmem:[%s2311_s3 + $0x58] sm:$0xff]  ;;  %v574_v22 = vld [vmem:[%s2311_s3 + $0x50] sm:$0xff] }
  0x44   : > { %525 = vmatpush.msrb.mxu2 %v448_v30  ;;  %332 = vmatmul.f32.vlgmr.msra.gmra.mxu0 %v1860_v32  ;;  %v624_v17 = vld [vmem:[%s2311_s3 + $0x1e0] sm:$0xff]  ;;  %v591_v19 = vld [vmem:[%s2311_s3 + $0xd8] sm:$0xff]  ;;  %v590_v23 = vld [vmem:[%s2311_s3 + $0xd0] sm:$0xff] }
  0x45   : > { %548 = vmatpush.msrb.mxu3 %v464_v31  ;;  %355 = vmatmul.f32.vlgmr.msra.gmra.mxu1 %v1860_v32  ;;  %v607_v20 = vld [vmem:[%s2311_s3 + $0x158] sm:$0xff]  ;;  %v573_v24 = vld [vmem:[%s2311_s3 + $0x48] sm:$0xff]  ;;  %v572_v26 = vld [vmem:[%s2311_s3 + $0x40] sm:$0xff] }
  0x46   : > { %378 = vmatmul.f32.vlgmr.msra.gmra.mxu2 %v1860_v32  ;;  %401 = vmatmul.f32.vlgmr.msra.gmra.mxu3 %v1860_v32  ;;  %v623_v21 = vld [vmem:[%s2311_s3 + $0x1d8] sm:$0xff]  ;;  %v589_v25 = vld [vmem:[%s2311_s3 + $0xc8] sm:$0xff]  ;;  %v588_v27 = vld [vmem:[%s2311_s3 + $0xc0] sm:$0xff] }
  0x47   : > { %480 = vmatpush.msrb.mxu0 %v415_v33  ;;  %503 = vmatpush.msrb.mxu1 %v431_v34  ;;  %v606_v28 = vld [vmem:[%s2311_s3 + $0x150] sm:$0xff]  ;;  %v605_v29 = vld [vmem:[%s2311_s3 + $0x148] sm:$0xff]  ;;  %v604_v30 = vld [vmem:[%s2311_s3 + $0x140] sm:$0xff] }
  0x48   : > { %526 = vmatpush.msrb.mxu2 %v447_v35  ;;  %549 = vmatpush.msrb.mxu3 %v463_v36  ;;  %v571_v31 = vld [vmem:[%s2311_s3 + $0x38] sm:$0xff]  ;;  %v622_v34 = vld [vmem:[%s2311_s3 + $0x1d0] sm:$0xff] }
  0x49   : > { %481 = vmatpush.msrb.mxu0 %v414_v37  ;;  %504 = vmatpush.msrb.mxu1 %v430_v38  ;;  %v587_v33 = vld [vmem:[%s2311_s3 + $0xb8] sm:$0xff]  ;;  %v570_v35 = vld [vmem:[%s2311_s3 + $0x30] sm:$0xff]  ;;  %v621_v37 = vld [vmem:[%s2311_s3 + $0x1c8] sm:$0xff] }
  0x4a   : > { %527 = vmatpush.msrb.mxu2 %v446_v39  ;;  %550 = vmatpush.msrb.mxu3 %v462_v40  ;;  %v586_v36 = vld [vmem:[%s2311_s3 + $0xb0] sm:$0xff]  ;;  %v569_v38 = vld [vmem:[%s2311_s3 + $0x28] sm:$0xff]  ;;  %v620_v40 = vld [vmem:[%s2311_s3 + $0x1c0] sm:$0xff] }
  0x4b   : > { %482 = vmatpush.msrb.mxu0 %v413_v41  ;;  %505 = vmatpush.msrb.mxu1 %v429_v42  ;;  %v585_v39 = vld [vmem:[%s2311_s3 + $0xa8] sm:$0xff]  ;;  %v603_v41 = vld [vmem:[%s2311_s3 + $0x138] sm:$0xff]  ;;  %v602_v42 = vld [vmem:[%s2311_s3 + $0x130] sm:$0xff] }
  0x4c   : > { %528 = vmatpush.msrb.mxu2 %v445_v43  ;;  %551 = vmatpush.msrb.mxu3 %v461_v44  ;;  %v601_v43 = vld [vmem:[%s2311_s3 + $0x128] sm:$0xff]  ;;  %v568_v44 = vld [vmem:[%s2311_s3 + $0x20] sm:$0xff] }
  0x4d   : > { %483 = vmatpush.msrb.mxu0 %v412_v45  ;;  %506 = vmatpush.msrb.mxu1 %v428_v46  ;;  %v584_v45 = vld [vmem:[%s2311_s3 + $0xa0] sm:$0xff]  ;;  %v619_v46 = vld [vmem:[%s2311_s3 + $0x1b8] sm:$0xff] }
  0x4e   : > { %529 = vmatpush.msrb.mxu2 %v444_v47  ;;  %552 = vmatpush.msrb.mxu3 %v460_v48  ;;  %v600_v47 = vld [vmem:[%s2311_s3 + $0x120] sm:$0xff]  ;;  %v599_v48 = vld [vmem:[%s2311_s3 + $0x118] sm:$0xff] }
  0x4f   : > { %335 = vmatmul.f32.gmra.mxu0 %v1915_v49  ;;  %358 = vmatmul.f32.gmra.mxu1 %v1915_v49 }
  0x50   : > { %381 = vmatmul.f32.gmra.mxu2 %v1915_v49  ;;  %404 = vmatmul.f32.gmra.mxu3 %v1915_v49 }
  0x51   : > { %484 = vmatpush.msrb.mxu0 %v411_v50  ;;  %507 = vmatpush.msrb.mxu1 %v427_v51  ;;  %v567_v50 = vld [vmem:[%s2311_s3 + $0x18] sm:$0xff] }
  0x52   : > { %530 = vmatpush.msrb.mxu2 %v443_v52  ;;  %553 = vmatpush.msrb.mxu3 %v459_v53  ;;  %v583_v51 = vld [vmem:[%s2311_s3 + $0x98] sm:$0xff]  ;;  %v618_v52 = vld [vmem:[%s2311_s3 + $0x1b0] sm:$0xff] }
  0x53   : > { %485 = vmatpush.msrb.mxu0 %v410_v54  ;;  %508 = vmatpush.msrb.mxu1 %v426_v55  ;;  %v566_v53 = vld [vmem:[%s2311_s3 + $0x10] sm:$0xff]  ;;  %v617_v55 = vld [vmem:[%s2311_s3 + $0x1a8] sm:$0xff] }
  0x54   : > { %531 = vmatpush.msrb.mxu2 %v442_v56  ;;  %554 = vmatpush.msrb.mxu3 %v458_v57  ;;  %v582_v54 = vld [vmem:[%s2311_s3 + $0x90] sm:$0xff]  ;;  %v565_v56 = vld [vmem:[%s2311_s3 + $0x8] sm:$0xff] }
  0x55   : > { %486 = vmatpush.msrb.mxu0 %v409_v58  ;;  %509 = vmatpush.msrb.mxu1 %v425_v59  ;;  %v581_v57 = vld [vmem:[%s2311_s3 + $0x88] sm:$0xff]  ;;  %v616_v58 = vld [vmem:[%s2311_s3 + $0x1a0] sm:$0xff]  ;;  %v598_v59 = vld [vmem:[%s2311_s3 + $0x110] sm:$0xff] }
  0x56   : > { %532 = vmatpush.msrb.mxu2 %v441_v60  ;;  %555 = vmatpush.msrb.mxu3 %v457_v61  ;;  %v597_v60 = vld [vmem:[%s2311_s3 + $0x108] sm:$0xff]  ;;  %v564_v61 = vld [vmem:[%s2311_s3] sm:$0xff] }
  0x57   : > { %487 = vmatpush.msrb.mxu0 %v408_v62  ;;  %510 = vmatpush.msrb.mxu1 %v424_v63  ;;  %v580_v62 = vld [vmem:[%s2311_s3 + $0x80] sm:$0xff]  ;;  %v615_v63 = vld [vmem:[%s2311_s3 + $0x198] sm:$0xff] }
  0x58   : > { %533 = vmatpush.msrb.mxu2 %v440_v0  ;;  %556 = vmatpush.msrb.mxu3 %v456_v1  ;;  %v614_v0 = vld [vmem:[%s2311_s3 + $0x190] sm:$0xff]  ;;  %v596_v1 = vld [vmem:[%s2311_s3 + $0x100] sm:$0xff] }
  0x59   : > { %488 = vmatmul.f32.vlgmr.msrb.gmra.mxu0 %v1860_v32  ;;  %511 = vmatmul.f32.vlgmr.msrb.gmra.mxu1 %v1860_v32 }
  0x5a   : > { %534 = vmatmul.f32.vlgmr.msrb.gmra.mxu2 %v1860_v32  ;;  %557 = vmatmul.f32.vlgmr.msrb.gmra.mxu3 %v1860_v32 }
  0x5b   : > { %628 = vmatpush.msra.mxu0 %v579_v2  ;;  %651 = vmatpush.msra.mxu1 %v595_v3  ;;  %v613_v2 = vld [vmem:[%s2311_s3 + $0x188] sm:$0xff]  ;;  %v612_v3 = vld [vmem:[%s2311_s3 + $0x180] sm:$0xff] }
  0x5c   : > { %674 = vmatpush.msra.mxu2 %v611_v4  ;;  %697 = vmatpush.msra.mxu3 %v627_v5 }
  0x5d   : > { %629 = vmatpush.msra.mxu0 %v578_v6  ;;  %652 = vmatpush.msra.mxu1 %v594_v7 }
  0x5e   : > { %675 = vmatpush.msra.mxu2 %v610_v8  ;;  %698 = vmatpush.msra.mxu3 %v626_v9 }
  0x5f   : > { %630 = vmatpush.msra.mxu0 %v577_v10  ;;  %653 = vmatpush.msra.mxu1 %v593_v11 }
  0x60   : > { %676 = vmatpush.msra.mxu2 %v609_v12  ;;  %699 = vmatpush.msra.mxu3 %v625_v13 }
  0x61   : > { %491 = vmatmul.f32.gmra.mxu0 %v1915_v49  ;;  %514 = vmatmul.f32.gmra.mxu1 %v1915_v49 }
  0x62   : > { %537 = vmatmul.f32.gmra.mxu2 %v1915_v49  ;;  %560 = vmatmul.f32.gmra.mxu3 %v1915_v49 }
  0x63   : > { %631 = vmatpush.msra.mxu0 %v576_v14  ;;  %654 = vmatpush.msra.mxu1 %v592_v15 }
  0x64   : > { %677 = vmatpush.msra.mxu2 %v608_v16  ;;  %700 = vmatpush.msra.mxu3 %v624_v17 }
  0x65   : > { %632 = vmatpush.msra.mxu0 %v575_v18  ;;  %655 = vmatpush.msra.mxu1 %v591_v19 }
  0x66   : > { %678 = vmatpush.msra.mxu2 %v607_v20  ;;  %701 = vmatpush.msra.mxu3 %v623_v21 }
  0x67   : > { %633 = vmatpush.msra.mxu0 %v574_v22  ;;  %656 = vmatpush.msra.mxu1 %v590_v23 }
  0x68   : > { %679 = vmatpush.msra.mxu2 %v606_v28  ;;  %702 = vmatpush.msra.mxu3 %v622_v34 }
  0x69   : > { %634 = vmatpush.msra.mxu0 %v573_v24  ;;  %657 = vmatpush.msra.mxu1 %v589_v25 }
  0x6a   : > { %680 = vmatpush.msra.mxu2 %v605_v29  ;;  %703 = vmatpush.msra.mxu3 %v621_v37 }
  0x6b   : > { %635 = vmatpush.msra.mxu0 %v572_v26  ;;  %658 = vmatpush.msra.mxu1 %v588_v27 }
  0x6c   : > { %681 = vmatpush.msra.mxu2 %v604_v30  ;;  %704 = vmatpush.msra.mxu3 %v620_v40 }
  0x6d   : > { %636 = vmatpush.msra.mxu0 %v571_v31  ;;  %659 = vmatpush.msra.mxu1 %v587_v33 }
  0x6e   : > { %682 = vmatpush.msra.mxu2 %v603_v41  ;;  %705 = vmatpush.msra.mxu3 %v619_v46 }
  0x6f   : > { %637 = vmatpush.msra.mxu0 %v570_v35  ;;  %660 = vmatpush.msra.mxu1 %v586_v36 }
  0x70   : > { %683 = vmatpush.msra.mxu2 %v602_v42  ;;  %706 = vmatpush.msra.mxu3 %v618_v52 }
  0x71   : > { %638 = vmatpush.msra.mxu0 %v569_v38  ;;  %661 = vmatpush.msra.mxu1 %v585_v39 }
  0x72   : > { %684 = vmatpush.msra.mxu2 %v601_v43  ;;  %707 = vmatpush.msra.mxu3 %v617_v55 }
  0x73   : > { %639 = vmatpush.msra.mxu0 %v568_v44  ;;  %662 = vmatpush.msra.mxu1 %v584_v45 }
  0x74   : > { %685 = vmatpush.msra.mxu2 %v600_v47  ;;  %708 = vmatpush.msra.mxu3 %v616_v58 }
  0x75   : > { %640 = vmatpush.msra.mxu0 %v567_v50  ;;  %663 = vmatpush.msra.mxu1 %v583_v51 }
  0x76   : > { %686 = vmatpush.msra.mxu2 %v599_v48  ;;  %709 = vmatpush.msra.mxu3 %v615_v63 }
  0x77   : > { %641 = vmatpush.msra.mxu0 %v566_v53  ;;  %664 = vmatpush.msra.mxu1 %v582_v54 }
  0x78   : > { %687 = vmatpush.msra.mxu2 %v598_v59  ;;  %710 = vmatpush.msra.mxu3 %v614_v0 }
  0x79   : > { %642 = vmatpush.msra.mxu0 %v565_v56  ;;  %665 = vmatpush.msra.mxu1 %v581_v57 }
  0x7a   : > { %688 = vmatpush.msra.mxu2 %v597_v60  ;;  %711 = vmatpush.msra.mxu3 %v613_v2 }
  0x7b   : > { %643 = vmatpush.msra.mxu0 %v564_v61  ;;  %666 = vmatpush.msra.mxu1 %v580_v62 }
  0x7c   : > { %644 = vmatmul.f32.vlgmr.msra.gmra.mxu0 %v1860_v32  ;;  %667 = vmatmul.f32.vlgmr.msra.gmra.mxu1 %v1860_v32 }
  0x7d   : > { %689 = vmatpush.msra.mxu2 %v596_v1  ;;  %712 = vmatpush.msra.mxu3 %v612_v3 }
  0x7e   : > { %690 = vmatmul.f32.vlgmr.msra.gmra.mxu2 %v1860_v32  ;;  %713 = vmatmul.f32.vlgmr.msra.gmra.mxu3 %v1860_v32 }
  0x84   : > { %647 = vmatmul.f32.gmra.mxu0 %v1915_v49  ;;  %670 = vmatmul.f32.gmra.mxu1 %v1915_v49 }
  0x86   : > { %693 = vmatmul.f32.gmra.mxu2 %v1915_v49  ;;  %716 = vmatmul.f32.gmra.mxu3 %v1915_v49 }
  0xc1   : > { %v333_v4 = vpop.f32.mrf.mxu0 }
  0xc2   : > { %v356_v5 = vpop.f32.mrf.mxu1 }
  0xc9   : > { %v379_v6 = vpop.f32.mrf.mxu2  ;;  %v402_v7 = vpop.f32.mrf.mxu3 }
  0xcc   : > { %v336_v8 = vpop.f32.mrf.mxu0  ;;  %v359_v9 = vpop.f32.mrf.mxu1 }
  0xd3   : > { %v382_v10 = vpop.f32.mrf.mxu2  ;;  %v405_v11 = vpop.f32.mrf.mxu3 }
  0xd6   : > { %v489_v12 = vpop.f32.mrf.mxu0  ;;  %v512_v13 = vpop.f32.mrf.mxu1 }
  0xdd   : > { %v535_v32 = vpop.f32.mrf.mxu2  ;;  %v558_v14 = vpop.f32.mrf.mxu3 }
  0xde   : > { %v492_v15 = vpop.f32.mrf.mxu0  ;;  %v515_v16 = vpop.f32.mrf.mxu1 }
  0xdf   : > { %1297 = vmatpush.xpose.msk.msrb.mxu0 %vm720_vm0, %v492_v15  ;;  %1301 = vmatpush.xpose.msk.msrb.mxu1 %vm720_vm0, %v515_v16 }
  0xe3   : > { %1298 = vmatpush.xpose.msk.msrb.mxu0 %vm720_vm0, %v489_v12  ;;  %1302 = vmatpush.xpose.msk.msrb.mxu1 %vm720_vm0, %v512_v13 }
  0xe5   : > { %v538_v49 = vpop.f32.mrf.mxu2  ;;  %v561_v17 = vpop.f32.mrf.mxu3 }
  0xe6   : > { %1305 = vmatpush.xpose.msk.msrb.mxu2 %vm720_vm0, %v538_v49  ;;  %1309 = vmatpush.xpose.msk.msrb.mxu3 %vm720_vm0, %v561_v17 }
  0xe7   : > { %1299 = vmatmul.msk.f32.vlgmr.msrb.gmra.mxu0 %vm720_vm0, %v333_v4  ;;  %1303 = vmatmul.msk.f32.vlgmr.msrb.gmra.mxu1 %vm720_vm0, %v356_v5 }
  0xea   : > { %1306 = vmatpush.xpose.msk.msrb.mxu2 %vm720_vm0, %v535_v32  ;;  %1310 = vmatpush.xpose.msk.msrb.mxu3 %vm720_vm0, %v558_v14 }
  0xed   : > { %1307 = vmatmul.msk.f32.vlgmr.msrb.gmra.mxu2 %vm720_vm0, %v379_v6  ;;  %1311 = vmatmul.msk.f32.vlgmr.msrb.gmra.mxu3 %vm720_vm0, %v402_v7 }
  0xef   : > { %1300 = vmatmul.msk.f32.gmra.mxu0 %vm720_vm0, %v336_v8  ;;  %1304 = vmatmul.msk.f32.gmra.mxu1 %vm720_vm0, %v359_v9 }
  0xf5   : > { %1308 = vmatmul.msk.f32.gmra.mxu2 %vm720_vm0, %v382_v10  ;;  %1312 = vmatmul.msk.f32.gmra.mxu3 %vm720_vm0, %v405_v11 }
  0xf9   : > { %v645_v18 = vpop.f32.mrf.mxu0  ;;  %v668_v19 = vpop.f32.mrf.mxu1 }
 0x101   : > { %v648_v20 = vpop.f32.mrf.mxu0  ;;  %v671_v21 = vpop.f32.mrf.mxu1 }
 0x102   : > { %954 = vmatpush.msra.mxu0 %v648_v20  ;;  %v691_v22 = vpop.f32.mrf.mxu2  ;;  %983 = vmatpush.msra.mxu1 %v671_v21  ;;  %v714_v23 = vpop.f32.mrf.mxu3  ;;  %v1067_v20 = vld [vmem:[%s2312_s4 + $0x8] sm:$0xff]  ;;  %v1066_v21 = vld [vmem:[%s2312_s4] sm:$0xff] }
 0x104   : > { %955 = vmatpush.msra.mxu0 %v645_v18  ;;  %984 = vmatpush.msra.mxu1 %v668_v19  ;;  %v1069_v18 = vld [vmem:[%s2312_s4 + $0x18] sm:$0xff]  ;;  %v1068_v19 = vld [vmem:[%s2312_s4 + $0x10] sm:$0xff] }
 0x106   : > { %1100 = vmatpush.msrb.mxu0 %v1069_v18 }
 0x108   : > { %1101 = vmatpush.msrb.mxu0 %v1068_v19 }
 0x10a   : > { %v694_v24 = vpop.f32.mrf.mxu2  ;;  %v717_v25 = vpop.f32.mrf.mxu3  ;;  %1102 = vmatpush.msrb.mxu0 %v1067_v20 }
 0x10b   : > { %1012 = vmatpush.msra.mxu2 %v694_v24  ;;  %1041 = vmatpush.msra.mxu3 %v717_v25  ;;  %v1072_v24 = vld [vmem:[%s2312_s4 + $0x30] sm:$0xff] }
 0x10c   : > { %1103 = vmatpush.msrb.mxu0 %v1066_v21  ;;  %v1076_v25 = vld [vmem:[%s2312_s4 + $0x50] sm:$0xff] }
 0x10d   : > { %1013 = vmatpush.msra.mxu2 %v691_v22  ;;  %1042 = vmatpush.msra.mxu3 %v714_v23  ;;  %v1073_v22 = vld [vmem:[%s2312_s4 + $0x38] sm:$0xff] }
 0x10e   : > { %v1077_v23 = vld [vmem:[%s2312_s4 + $0x58] sm:$0xff]  ;;  %1129 = vmatpush.msrb.mxu1 %v1073_v22 }
 0x10f   : > { %1158 = vmatpush.msrb.mxu2 %v1077_v23 }
 0x110   : > { %1130 = vmatpush.msrb.mxu1 %v1072_v24 }
 0x111   : > { %1159 = vmatpush.msrb.mxu2 %v1076_v25 }
 0x164   : > { %v750_v26 = vpop.f32.mrf.mxu0  ;;  %v785_v27 = vpop.f32.mrf.mxu1 }
 0x165   : > { %v868_v28 = vsel %vm861_vm1, %v785_v27, -inf  ;;  %v862_v29 = vsel %vm861_vm1, %v750_v26, -inf }
 0x166   : > { %869 = vmax.xlane.f32.xlu2 %v868_v28  ;;  %863 = vmax.xlane.f32.xlu1 %v862_v29  ;;  %v1070_v28 = vld [vmem:[%s2312_s4 + $0x20] sm:$0xff] }
 0x167   : > { %v1074_v29 = vld [vmem:[%s2312_s4 + $0x40] sm:$0xff] }
 0x16c   : > { %v753_v39 = vpop.f32.mrf.mxu0  ;;  %v788_v40 = vpop.f32.mrf.mxu1 }
 0x16d   : > { %v865_v41 = vsel %vm861_vm1, %v753_v39, -inf  ;;  %v871_v42 = vsel %vm861_vm1, %v788_v40, -inf }
 0x170   : > { %v820_v30 = vpop.f32.mrf.mxu2  ;;  %v855_v31 = vpop.f32.mrf.mxu3 }
 0x171   : > { %v874_v33 = vsel %vm861_vm1, %v820_v30, -inf  ;;  %v880_v36 = vsel %vm861_vm1, %v855_v31, -inf }
 0x172   : > { %875 = vmax.xlane.f32.xlu0 %v874_v33 }
 0x178   : > { %v823_v34 = vpop.f32.mrf.mxu2  ;;  %v858_v35 = vpop.f32.mrf.mxu3 }
 0x179   : > { %v883_v37 = vsel %vm861_vm1, %v858_v35, -inf  ;;  %v877_v38 = vsel %vm861_vm1, %v823_v34, -inf }
 0x17a   : > { %881 = vmax.xlane.f32.xlu0 %v880_v36  ;;  %884 = vmax.xlane.f32.xlu2 %v883_v37 }
 0x17b   : > { %878 = vmax.xlane.f32.xlu1 %v877_v38 }
 0x182   : > { %866 = vmax.xlane.f32.xlu0 %v865_v41 }
 0x183   : > { %872 = vmax.xlane.f32.xlu1 %v871_v42 }
 0x1d9   : > { %v870_v43 = vpop.xlane.xlu2 %869  ;;  %v864_v44 = vpop.xlane.xlu1 %863 }
 0x1da   : > { %v888_v45 = vsub.f32 %v785_v27, %v870_v43  ;;  %v886_v46 = vsub.f32 %v750_v26, %v864_v44  ;;  %v1071_v26 = vld [vmem:[%s2312_s4 + $0x28] sm:$0xff] }
 0x1db   : > { %v1075_v27 = vld [vmem:[%s2312_s4 + $0x48] sm:$0xff]  ;;  %1131 = vmatpush.msrb.mxu1 %v1071_v26 }
 0x1dc   : > { %v898_v47 = vmul.f32 1.442695, %v888_v45  ;;  %v894_v48 = vmul.f32 1.442695, %v886_v46  ;;  %1160 = vmatpush.msrb.mxu2 %v1075_v27 }
 0x1dd   : > { %1132 = vmatpush.msrb.mxu1 %v1070_v28 }
 0x1de   : > { %1378 = vpow2.f32 %v898_v47  ;;  %1161 = vmatpush.msrb.mxu2 %v1074_v29 }
 0x1df   : > { %1380 = vpow2.f32 %v894_v48 }
 0x1e4   : > { %v1379_v50 = vpop.eup %1378 }
 0x1e5   : > { %v1381_v51 = vpop.eup %1380  ;;  %v876_v52 = vpop.xlane.xlu0 %875  ;;  %1315 = vmatmul.msk.f32.vlgmr.msra.gmra.mxu1 %vm861_vm1, %v1379_v50  ;;  %v916_v10 = vsel %vm861_vm1, %v1379_v50, 0.0 }
 0x1e6   : > { %v890_v53 = vsub.f32 %v820_v30, %v876_v52  ;;  %1313 = vmatmul.msk.f32.vlgmr.msra.gmra.mxu0 %vm861_vm1, %v1381_v51  ;;  %v910_v54 = vsel %vm861_vm1, %v1381_v51, 0.0  ;;  %v1081_v30 = vld [vmem:[%s2312_s4 + $0x78] sm:$0xff] }
 0x1e7   : > { %911 = vadd.xlane.f32.xlu0 %v910_v54  ;;  %1187 = vmatpush.msrb.mxu3 %v1081_v30 }
 0x1e8   : > { %v902_v55 = vmul.f32 1.442695, %v890_v53 }
 0x1ea   : > { %1382 = vpow2.f32 %v902_v55 }
 0x1ed   : > { %v882_v56 = vpop.xlane.xlu0 %881  ;;  %v885_v57 = vpop.xlane.xlu2 %884 }
 0x1ee   : > { %v892_v58 = vsub.f32 %v855_v31, %v882_v56  ;;  %v879_v59 = vpop.xlane.xlu1 %878  ;;  %v893_v63 = vsub.f32 %v858_v35, %v885_v57  ;;  %v1080_v31 = vld [vmem:[%s2312_s4 + $0x70] sm:$0xff]  ;;  %v1078_v35 = vld [vmem:[%s2312_s4 + $0x60] sm:$0xff] }
 0x1ef   : > { %v891_v60 = vsub.f32 %v823_v34, %v879_v59  ;;  %1188 = vmatpush.msrb.mxu3 %v1080_v31  ;;  %v1079_v34 = vld [vmem:[%s2312_s4 + $0x68] sm:$0xff] }
 0x1f0   : > { %v1383_v61 = vpop.eup %1382  ;;  %v906_v62 = vmul.f32 1.442695, %v892_v58  ;;  %v908_v2 = vmul.f32 1.442695, %v893_v63 }
 0x1f1   : > { %v904_v0 = vmul.f32 1.442695, %v891_v60  ;;  %1317 = vmatmul.msk.f32.vlgmr.msra.gmra.mxu2 %vm861_vm1, %v1383_v61  ;;  %v922_v1 = vsel %vm861_vm1, %v1383_v61, 0.0  ;;  %1189 = vmatpush.msrb.mxu3 %v1079_v34 }
 0x1f2   : > { %1384 = vpow2.f32 %v906_v62  ;;  %923 = vadd.xlane.f32.xlu2 %v922_v1 }
 0x1f3   : > { %1386 = vpow2.f32 %v904_v0  ;;  %1190 = vmatpush.msrb.mxu3 %v1078_v35 }
 0x1f4   : > { %1388 = vpow2.f32 %v908_v2 }
 0x1f5   : > { %v867_v3 = vpop.xlane.xlu0 %866 }
 0x1f6   : > { %v873_v4 = vpop.xlane.xlu1 %872  ;;  %v887_v5 = vsub.f32 %v753_v39, %v867_v3 }
 0x1f7   : > { %v889_v6 = vsub.f32 %v788_v40, %v873_v4 }
 0x1f8   : > { %v1385_v7 = vpop.eup %1384  ;;  %v896_v8 = vmul.f32 1.442695, %v887_v5  ;;  %v1377_v5 = vld [vmem:[%s2313_s5] ss:$0 sm:$0xff] }
 0x1f9   : > { %v900_v9 = vmul.f32 1.442695, %v889_v6  ;;  %1319 = vmatmul.msk.f32.vlgmr.msra.gmra.mxu3 %vm861_vm1, %v1385_v7  ;;  %v928_v11 = vsel %vm861_vm1, %v1385_v7, 0.0  ;;  %v1387_v12 = vpop.eup %1386 }
 0x1fa   : > { %1390 = vpow2.f32 %v896_v8  ;;  %917 = vadd.xlane.f32.xlu2 %v916_v10  ;;  %929 = vadd.xlane.f32.xlu1 %v928_v11  ;;  %v925_v13 = vsel %vm861_vm1, %v1387_v12, 0.0  ;;  %v1389_v32 = vpop.eup %1388 }
 0x1fb   : > { %1392 = vpow2.f32 %v900_v9  ;;  %1318 = vmatmul.msk.f32.gmra.mxu2 %vm861_vm1, %v1387_v12  ;;  %926 = vadd.xlane.f32.xlu0 %v925_v13  ;;  %v931_v16 = vsel %vm861_vm1, %v1389_v32, 0.0 }
 0x200   : > { %v1391_v14 = vpop.eup %1390 }
 0x201   : > { %v1393_v15 = vpop.eup %1392  ;;  %1314 = vmatmul.msk.f32.gmra.mxu0 %vm861_vm1, %v1391_v14  ;;  %1320 = vmatmul.msk.f32.gmra.mxu3 %vm861_vm1, %v1389_v32  ;;  %v913_v49 = vsel %vm861_vm1, %v1391_v14, 0.0 }
 0x202   : > { %1316 = vmatmul.msk.f32.gmra.mxu1 %vm861_vm1, %v1393_v15  ;;  %932 = vadd.xlane.f32.xlu2 %v931_v16  ;;  %v919_v17 = vsel %vm861_vm1, %v1393_v15, 0.0 }
 0x203   : > { %914 = vadd.xlane.f32.xlu1 %v913_v49  ;;  %920 = vadd.xlane.f32.xlu0 %v919_v17 }
 0x25a   : > { %v912_v33 = vpop.xlane.xlu0 %911 }
 0x25b   : > { %1394 = vrcp.f32 %v912_v33 }
 0x261   : > { %v1395_v36 = vpop.eup %1394 }
 0x262   : > { %v986_v45 = vpop.f32.mrf.mxu1 }
 0x263   : > { %v957_v37 = vpop.f32.mrf.mxu0 }
 0x264   : > { %v1058_v38 = vmul.f32 %v1395_v36, %v957_v37 }
 0x265   : > { %v924_v39 = vpop.xlane.xlu2 %923 }
 0x266   : > { %1321 = vmatmul.msk.f32.vlgmr.msrb.gmra.mxu0 %vm720_vm0, %v1058_v38  ;;  %1396 = vrcp.f32 %v924_v39 }
 0x26c   : > { %v1397_v43 = vpop.eup %1396 }
 0x26d   : > { %v918_v40 = vpop.xlane.xlu2 %917  ;;  %v930_v41 = vpop.xlane.xlu1 %929 }
 0x26e   : > { %1398 = vrcp.f32 %v918_v40  ;;  %v927_v42 = vpop.xlane.xlu0 %926 }
 0x26f   : > { %1400 = vrcp.f32 %v930_v41 }
 0x270   : > { %1402 = vrcp.f32 %v927_v42 }
 0x274   : > { %v1399_v44 = vpop.eup %1398  ;;  %v1015_v46 = vpop.f32.mrf.mxu2 }
 0x275   : > { %v1060_v47 = vmul.f32 %v1399_v44, %v986_v45  ;;  %v1062_v48 = vmul.f32 %v1397_v43, %v1015_v46  ;;  %v933_v52 = vpop.xlane.xlu2 %932  ;;  %v1401_v53 = vpop.eup %1400 }
 0x276   : > { %v915_v50 = vpop.xlane.xlu1 %914  ;;  %v921_v51 = vpop.xlane.xlu0 %920 }
 0x277   : > { %1323 = vmatmul.msk.f32.vlgmr.msrb.gmra.mxu1 %vm720_vm0, %v1060_v47  ;;  %1325 = vmatmul.msk.f32.vlgmr.msrb.gmra.mxu2 %vm720_vm0, %v1062_v48  ;;  %1404 = vrcp.f32 %v915_v50  ;;  %v1403_v55 = vpop.eup %1402 }
 0x278   : > { %1406 = vrcp.f32 %v921_v51 }
 0x279   : > { %1408 = vrcp.f32 %v933_v52 }
 0x27c   : > { %v1044_v54 = vpop.f32.mrf.mxu3 }
 0x27d   : > { %v1064_v56 = vmul.f32 %v1401_v53, %v1044_v54  ;;  %v1405_v57 = vpop.eup %1404 }
 0x27e   : > { %v1018_v58 = vpop.f32.mrf.mxu2  ;;  %v960_v59 = vpop.f32.mrf.mxu0 }
 0x27f   : > { %v1407_v60 = vpop.eup %1406  ;;  %v1063_v61 = vmul.f32 %v1403_v55, %v1018_v58  ;;  %v1059_v62 = vmul.f32 %v1405_v57, %v960_v59  ;;  %v989_v63 = vpop.f32.mrf.mxu1  ;;  %1327 = vmatmul.msk.f32.vlgmr.msrb.gmra.mxu3 %vm720_vm0, %v1064_v56 }
 0x280   : > { %v1061_v0 = vmul.f32 %v1407_v60, %v989_v63  ;;  %v1409_v1 = vpop.eup %1408 }
 0x281   : > { %1326 = vmatmul.msk.f32.gmra.mxu2 %vm720_vm0, %v1063_v61  ;;  %1322 = vmatmul.msk.f32.gmra.mxu0 %vm720_vm0, %v1059_v62 }
 0x282   : > { %1324 = vmatmul.msk.f32.gmra.mxu1 %vm720_vm0, %v1061_v0 }
 0x284   : > { %v1047_v2 = vpop.f32.mrf.mxu3 }
 0x285   : > { %v1065_v3 = vmul.f32 %v1409_v1, %v1047_v2 }
 0x287   : > { %1328 = vmatmul.msk.f32.gmra.mxu3 %vm720_vm0, %v1065_v3 }
 0x2e3   : > { %v1105_v4 = vpop.f32.mrf.mxu0 }
 0x2e4   : > { %v1202_v8 = vadd.f32 %v1377_v5, %v1105_v4 }
 0x2f4   : > { %v1134_v6 = vpop.f32.mrf.mxu1 }
 0x2f5   : > { %v1204_v10 = vadd.f32 %v1202_v8, %v1134_v6 }
 0x2fa   : > { %v1163_v7 = vpop.f32.mrf.mxu2 }
 0x2fb   : > { %v1206_v11 = vadd.f32 %v1204_v10, %v1163_v7 }
 0x2fe   : > { %v1108_v9 = vpop.f32.mrf.mxu0 }
 0x2ff   : > { %v1203_v12 = vadd.f32 %v1377_v5, %v1108_v9  ;;  %v1137_v14 = vpop.f32.mrf.mxu1 }
 0x301   : > { %v1205_v15 = vadd.f32 %v1203_v12, %v1137_v14 }
 0x302   : > { %v1192_v13 = vpop.f32.mrf.mxu3 }
 0x303   : > { %v1208_v32 = vadd.f32 %v1206_v11, %v1192_v13 }
 0x304   : > { %v1166_v16 = vpop.f32.mrf.mxu2 }
 0x305   : > { %1210 = vst [vmem:[%s244_s20] sm:$0xff] %v1208_v32  ;;  %v1207_v49 = vadd.f32 %v1205_v15, %v1166_v16 }
 0x30a   : > { %v1195_v17 = vpop.f32.mrf.mxu3 }
 0x30b   : > { %v1209_v18 = vadd.f32 %v1207_v49, %v1195_v17 }
 0x30d   : > { %1211 = vst [vmem:[%s244_s20 + $0x8] sm:$0xff] %v1209_v18 }
 0x30e   : > { %1437 = shalt.err (!%p1434_p3)
}
 0x30f   : > { %s1474_s14 = smov 128   ;;  %s1475_s17 = smov 8  }
 0x310   : > { %1336 = dma.vmem_to_hbm [thread:$0]  (%p1549_p5), %s1226_s19, 256, %s1228_s9, %s1213_s25, %s1474_s14, %s1474_s14, %s1475_s17  }
 0x311 PF: > { %p1342_p4 = scmp.ge.s32.totalorder %s1472_s24, 2  ;;  %s1242_s20 = sand.u32 1, %s1460_s21  }
 0x312   : > { %s1243_s26 = scalar_lea.sflag [#allocation3], %s1242_s20 }
 0x313   : > { %p1339_p7 = pnand %p1342_p4, %p1553_p6 }
 0x315   : > { %p1340_p8 = pneg %p1339_p7 }
 0x317   : > { %1455 = dma.done.wait (%p1340_p8), %s1243_s26, 256  }
 0x318   : > { %1457 = vsyncadd (%p1340_p8), %s1243_s26, 4294967040  ;;  %p16_p9 = scmp.ge.s32.totalorder %s1536_s27, 4   ;;  %s2317_s21 = smov %s1464_s22 }
 0x319   : > { %s2318_s22 = smov %s1468_s23  ;;  %s2319_s23 = smov %s1547_s30 }
 0x31a   : > { %s2320_s24 = smov %s1536_s27  ;;  %18 = sbr.rel (!%p16_p9) target bundleno = 3 (0x3), region = 79 }
 0x31f   :  { %1249 = vsyncpa [#allocation3], 1 }
 0x320   :  { %1251 = vsyncpa [#allocation3 + $0x1], 1 }

</bundles_post_ra>
